<compile_context>
chip_gen: v5e
topology: v5e:2x2
jax: 0.10.0
libtpu: 0.0.40
codegen_flags: <defaults>
</compile_context>

<pallas_src>
import jax
import jax.numpy as jnp
from jax.experimental import pallas as pl
from jax.experimental.pallas import tpu as pltpu

LANE = 128      # lane width (last dim tiling)
SUBLANE = 8     # sublane width (second-to-last dim tiling)


def _round_up(x, m):
    return (x + m - 1) // m * m


def _linear_kernel(x_ref, wt_ref, b_ref, o_ref):
    # x_ref : [TM, K]       VMEM
    # wt_ref: [K, N_pad]    VMEM (pre-transposed, lane-padded weight)
    # b_ref : [1, N_pad]    VMEM (lane-padded bias row)
    # o_ref : [TM, N_pad]   VMEM (lane-dense output tile)
    acc = jnp.dot(x_ref[...], wt_ref[...], preferred_element_type=jnp.float32)
    o_ref[...] = (acc + b_ref[...]).astype(o_ref.dtype)


def prepare_params(weight, bias):
    """One-time parameter prep (do this at parameter-load time, NOT per call).

    weight: [y_dim, input_size] (PyTorch Linear layout)
    bias:   [y_dim]
    returns (wt_pad [input_size, N_pad], b_pad [1, N_pad]) with N_pad = 128*ceil(y/128)
    """
    y_dim, k = weight.shape
    n_pad = _round_up(max(y_dim, LANE), LANE)
    wt_pad = jnp.zeros((k, n_pad), weight.dtype).at[:, :y_dim].set(weight.T)
    b_pad = jnp.zeros((1, n_pad), bias.dtype).at[:, :y_dim].set(bias)
    return wt_pad, b_pad


def classifier_forward(x, wt_pad, b_pad, y_dim, tile_m=512):
    """y = x @ weight.T + bias   (nn.Linear semantics) via a Pallas kernel.

    x:      [B, input_size] float32
    wt_pad: [input_size, N_pad] float32 (from prepare_params)
    b_pad:  [1, N_pad] float32          (from prepare_params)
    returns [B, y_dim] float32
    """
    B, K = x.shape
    n_pad = wt_pad.shape[1]

    # Batch tiling: small B -> single sublane-aligned tile; large B -> 512-row
    # tiles pipelined and sharded across TensorCores ("parallel" axis).
    tm = min(tile_m, _round_up(B, SUBLANE))
    b_padded = _round_up(B, tm)
    if b_padded != B:
        x = jnp.pad(x, ((0, b_padded - B), (0, 0)))
    grid = (b_padded // tm,)

    out = pl.pallas_call(
        _linear_kernel,
        out_shape=jax.ShapeDtypeStruct((b_padded, n_pad), x.dtype),
        grid=grid,
        in_specs=[
            pl.BlockSpec((tm, K), lambda i: (i, 0)),        # x tile streams
            pl.BlockSpec((K, n_pad), lambda i: (0, 0)),     # weight resident
            pl.BlockSpec((1, n_pad), lambda i: (0, 0)),     # bias resident
        ],
        out_specs=pl.BlockSpec((tm, n_pad), lambda i: (i, 0)),  # lane-dense
        compiler_params=pltpu.CompilerParams(
            dimension_semantics=("parallel",)),
    )(x, wt_pad, b_pad)

    return out[:B, :y_dim]


if __name__ == "__main__":
    # Small shapes consistent with the module: batch=8, input_size=32, y_dim=16
    B, input_size, y_dim = 8, 32, 16

    key = jax.random.PRNGKey(0)
    kx, kw, kb = jax.random.split(key, 3)

    x = jax.random.normal(kx, (B, input_size), dtype=jnp.float32)
    # Deterministic synthetic params (mimics Linear's uniform(-1/sqrt(in), 1/sqrt(in)))
    bound = 1.0 / jnp.sqrt(jnp.float32(input_size))
    weight = jax.random.uniform(kw, (y_dim, input_size), dtype=jnp.float32,
                                minval=-bound, maxval=bound)
    bias = jax.random.uniform(kb, (y_dim,), dtype=jnp.float32,
                              minval=-bound, maxval=bound)

    # One-time param prep (transpose + lane-pad) — outside the hot path.
    wt_pad, b_pad = prepare_params(weight, bias)

    out = classifier_forward(x, wt_pad, b_pad, y_dim)
    out = jax.block_until_ready(out)

    # Reference check in plain JAX (nn.Linear semantics)
    ref = x @ weight.T + bias
    assert out.shape == (B, y_dim)
    assert jnp.allclose(out, ref, atol=1e-5, rtol=1e-5)

    print("KERNEL_OK")
</pallas_src>

<mosaic_0001>
module attributes {stable_mosaic.version = 11 : i64} {
  func.func @_linear_kernel(%arg0: i32, %arg1: memref<8x32xf32, #tpu.memory_space<vmem>>, %arg2: memref<32x128xf32, #tpu.memory_space<vmem>>, %arg3: memref<1x128xf32, #tpu.memory_space<vmem>>, %arg4: memref<8x128xf32, #tpu.memory_space<vmem>>) attributes {dimension_semantics = [#tpu.dimension_semantics<parallel>], iteration_bounds = array<i64: 1>, scalar_prefetch = 0 : i64, scratch_operands = 0 : i64, tpu.core_type = #tpu.core_type<tc>, window_params = [{transform_indices = @transform_0, window_bounds = array<i64: 8, 32>}, {pipeline_mode = #tpu.pipeline_mode<synchronous>, transform_indices = @transform_1, window_bounds = array<i64: 32, 128>}, {pipeline_mode = #tpu.pipeline_mode<synchronous>, transform_indices = @transform_2, window_bounds = array<i64: 1, 128>}, {transform_indices = @transform_3, window_bounds = array<i64: 8, 128>}]} {
    %c0 = arith.constant 0 : index
    %c0_0 = arith.constant 0 : index
    %0 = vector.load %arg1[%c0, %c0_0] : memref<8x32xf32, #tpu.memory_space<vmem>>, vector<8x32xf32>
    %c0_1 = arith.constant 0 : index
    %c0_2 = arith.constant 0 : index
    %1 = vector.load %arg2[%c0_1, %c0_2] : memref<32x128xf32, #tpu.memory_space<vmem>>, vector<32x128xf32>
    %cst = arith.constant dense<0.000000e+00> : vector<8x128xf32>
    %2 = tpu.matmul %0, %1, %cst {dimension_numbers = #tpu.dot_dimension_numbers<[1], [0], [0], [1], [0, 0, 1, 1], [], []>} : vector<8x32xf32>, vector<32x128xf32>, vector<8x128xf32> -> vector<8x128xf32>
    %c0_3 = arith.constant 0 : index
    %c0_4 = arith.constant 0 : index
    %3 = vector.load %arg3[%c0_3, %c0_4] : memref<1x128xf32, #tpu.memory_space<vmem>>, vector<1x128xf32>
    %4 = vector.broadcast %3 : vector<1x128xf32> to vector<8x128xf32>
    %5 = arith.addf %2, %4 : vector<8x128xf32>
    %c0_5 = arith.constant 0 : index
    %c0_6 = arith.constant 0 : index
    %6 = vector.load %arg4[%c0_5, %c0_6] : memref<8x128xf32, #tpu.memory_space<vmem>>, vector<8x128xf32>
    tpu.vector_store %arg4[%c0_5, %c0_6], %5 {strides = array<i32>} : memref<8x128xf32, #tpu.memory_space<vmem>>, vector<8x128xf32>,
    return
  }
  func.func @transform_0(%arg0: i32) -> (i32, i32) {
    %c0_i32 = arith.constant 0 : i32
    %c0_i32_0 = arith.constant 0 : i32
    return %arg0, %c0_i32 : i32, i32
  }
  func.func @transform_1(%arg0: i32) -> (i32, i32) {
    %c0_i32 = arith.constant 0 : i32
    %c0_i32_0 = arith.constant 0 : i32
    %c0_i32_1 = arith.constant 0 : i32
    return %c0_i32, %c0_i32_0 : i32, i32
  }
  func.func @transform_2(%arg0: i32) -> (i32, i32) {
    %c0_i32 = arith.constant 0 : i32
    %c0_i32_0 = arith.constant 0 : i32
    %c0_i32_1 = arith.constant 0 : i32
    return %c0_i32, %c0_i32_0 : i32, i32
  }
  func.func @transform_3(%arg0: i32) -> (i32, i32) {
    %c0_i32 = arith.constant 0 : i32
    %c0_i32_0 = arith.constant 0 : i32
    return %arg0, %c0_i32 : i32, i32
  }
}

</mosaic_0001>

<bundles_post_ra>
// kernel: tpu_custom_call.1
= control target key start
LH: loop header
LB: loop body
LE: loop exit
PB: predicated region body
PF: predicated region fallthrough
CT: control target
= control target key end

     0   :  { %8 = vsyncpa [#allocation3], 0  ;;  %s219_s0 = inlined_call_operand.hbm [shape: f32[8,32], index: 0, kind: input, shape index: {}]   ;;  %s220_s1 = inlined_call_operand.hbm [shape: f32[32,128], index: 1, kind: input, shape index: {}]   ;;  %s221_s2 = inlined_call_operand.vmem [shape: f32[1,128], index: 2, kind: input, shape index: {}]   ;;  %s222_s3 = inlined_call_operand.hbm [shape: f32[8,128], index: 3, kind: output, shape index: {}]  }
   0x1   :  { %9 = vsyncpa [#allocation6], 0 }
   0x2   :  { %10 = vsyncpa [#allocation4], 0  ;;  %s16_s14 = sshll.u32 %s219_s0, 4  ;;  %s182_s15 = smov [#allocation2]   ;;  %s17_s14 = int_to_ptr.hbm [resolvable:$true] %s16_s14 }
   0x3   :  { %s18_s16 = sshll.u32 %s182_s15, 4  ;;  %s26_s19 = sshll.u32 %s220_s1, 4  ;;  %s19_s16 = int_to_ptr.vmem [resolvable:$true] %s18_s16  ;;  %s27_s19 = int_to_ptr.hbm [resolvable:$true] %s26_s19 }
   0x4   :  { %21 = dma.hbm_to_vmem [thread:$0]  %s17_s14, 128, %s19_s16, [#allocation3]  }
   0x5   :  { %s183_s20 = smov [#allocation5]   ;;  %s184_s22 = smov 128  }
   0x6   :  { %s28_s21 = sshll.u32 %s183_s20, 4  ;;  %s185_s23 = smov 8   ;;  %s29_s21 = int_to_ptr.vmem [resolvable:$true] %s28_s21 }
   0x7   :  { %34 = dma.hbm_to_vmem [thread:$0]  %s27_s19, 512, %s29_s21, [#allocation6], %s184_s22, %s184_s22, %s185_s23  }
   0x8   :  { %176 = dma.done.wait [#allocation3], 128  }
   0x9   :  { %177 = vsyncadd [#allocation3], 4294967168 }
   0xa   :  { %178 = dma.done.wait [#allocation6], 512  }
   0xb   :  { %179 = vsyncadd [#allocation6], 4294966784  ;;  %v49_v0 = vld [vmem:[#allocation5 + $0x18] sm:$0xff]  ;;  %v48_v1 = vld [vmem:[#allocation5 + $0x10] sm:$0xff]  ;;  %vm54_vm0 = vcmask 261120   ;;  %s186_s24 = smov [#allocation7]  }
   0xc   :  { %70 = vmatpush.msra.mxu0 %v49_v0  ;;  %v47_v2 = vld [vmem:[#allocation5 + $0x8] sm:$0xff]  ;;  %v46_v3 = vld [vmem:[#allocation5] sm:$0xff]  ;;  %v45_v4 = vld [vmem:[#allocation2] sm:$0xff]  ;;  %s84_s25 = sshll.u32 %s186_s24, 4  ;;  %s86_s28 = sshll.u32 %s222_s3, 4  ;;  %s85_s25 = int_to_ptr.vmem [resolvable:$true] %s84_s25  ;;  %s87_s28 = int_to_ptr.hbm [resolvable:$true] %s86_s28 }
   0xd   :  { %v103_v5 = vld [vmem:[%s221_s2] ss:$0 sm:$0xff] }
   0xe   :  { %71 = vmatpush.msra.mxu0 %v48_v1 }
  0x10   :  { %72 = vmatpush.msra.mxu0 %v47_v2 }
  0x12   :  { %73 = vmatpush.msra.mxu0 %v46_v3 }
  0x13   :  { %97 = vmatmul.msk.f32.vlgmr.msra.gmra.mxu0 %vm54_vm0, %v45_v4 }
  0x90   :  { %v75_v6 = vpop.f32.mrf.mxu0 }
  0x91   :  { %v76_v7 = vadd.f32 %v103_v5, %v75_v6 }
  0x93   :  { %78 = vst [vmem:[#allocation7] sm:$0xff] %v76_v7 }
  0x94   :  { %89 = dma.vmem_to_hbm [thread:$0]  %s85_s25, 128, %s87_s28, [#allocation4]  }
  0x95   :  { %180 = dma.done.wait [#allocation4], 128  }
  0x96   :  { %181 = vsyncadd [#allocation4], 4294967168 }
  0x97   :  { %94 = vsyncpa [#allocation3], 1 }
  0x98   :  { %95 = vsyncpa [#allocation6], 1 }
  0x99   :  { %96 = vsyncpa [#allocation4], 1 }

</bundles_post_ra>
